<compile_context>
chip_gen: v6e
topology: v6e:2x2x1
jax: 0.10.0
libtpu: 0.0.40
codegen_flags: <defaults>
</compile_context>

<pallas_src>
import functools

import jax
import jax.numpy as jnp
from jax.experimental import pallas as pl
from jax.experimental.pallas import tpu as pltpu


def _round_up(x: int, m: int) -> int:
    return ((x + m - 1) // m) * m


def _cdiv(a: int, b: int) -> int:
    return (a + b - 1) // b


def _ffnn_fused_kernel(x_ref, b_ref, *rest, pdims, compute_dtype):
    """Fused forward for one batch tile.

    x_ref : (TB, IN_PAD)            compute_dtype
    b_ref : (L, MAX_OUT_PAD)        f32   (zero-padded, packed biases)
    rest  = (w_0, ..., w_{L-1}, o_ref, h_scratch)
      w_k      : (in_pad_k, out_pad_k)  compute_dtype (zero-padded)
      o_ref    : (TB, OUT_PAD_last)     f32
      h_scratch: (TB, MAX_HID_PAD)      compute_dtype (inter-layer activations)
    """
    num_layers = len(pdims) - 1
    w_refs = rest[:num_layers]
    o_ref = rest[num_layers]
    h_ref = rest[num_layers + 1]

    for k in range(num_layers):
        out_pad = pdims[k + 1]
        # Layer input: x tile for layer 0, staged VMEM scratch afterwards.
        h = x_ref[...] if k == 0 else h_ref[:, :pdims[k]]
        acc = jnp.dot(h, w_refs[k][...],
                      preferred_element_type=jnp.float32)      # (TB, out_pad) f32
        acc = acc + b_ref[k:k + 1, :out_pad]                   # bias in f32
        if k < num_layers - 1:
            # ReLU (dropout == identity in eval) in f32, store as compute_dtype.
            h_ref[:, :out_pad] = jnp.maximum(acc, 0.0).astype(compute_dtype)
        else:
            o_ref[...] = acc.astype(o_ref.dtype)


def _ffnn_forward_fused(params, x, *, compute_dtype=jnp.bfloat16, tb=512):
    """params: list of (w (in,out) f32, b (out,) f32); x: (B, IN) f32."""
    B, IN = x.shape
    num_layers = len(params)
    dims = [IN] + [w.shape[1] for (w, _) in params]
    # Lane-dense: pad every feature dim to a multiple of 128.
    pdims = [_round_up(d, 128) for d in dims]
    max_out = max(pdims[1:])
    max_hid = max(pdims[1:-1]) if num_layers > 1 else 128  # scratch width

    c_itemsize = jnp.dtype(compute_dtype).itemsize

    # ---- Batch tiling -------------------------------------------------------
    # >= 2 tiles when B >= 16 so v7x's two TensorCores both get a share of the
    # ("parallel",) grid axis; tile sized from ceil(B / n_tiles) so padding
    # waste stays small; TB a multiple of 8 sublanes, capped at tb.
    min_tiles = 2 if B >= 16 else 1
    n_tiles = max(min_tiles, _cdiv(B, tb))
    TB = min(_round_up(_cdiv(B, n_tiles), 8), _round_up(tb, 8))
    grid_b = _cdiv(B, TB)
    B_pad = grid_b * TB

    # ---- Pad / pack operands ------------------------------------------------
    # x padded & cast to compute_dtype in the wrapper (halves activation DMA).
    x_p = jnp.zeros((B_pad, pdims[0]), compute_dtype).at[:B, :IN].set(
        x.astype(compute_dtype))

    w_padded = []
    b_packed = jnp.zeros((num_layers, max_out), jnp.float32)
    for k, (w, b) in enumerate(params):
        wp = jnp.zeros((pdims[k], pdims[k + 1]), compute_dtype)
        wp = wp.at[:w.shape[0], :w.shape[1]].set(w.astype(compute_dtype))
        w_padded.append(wp)
        b_packed = b_packed.at[k, :b.shape[0]].set(b)

    # ---- VMEM budget (explicit limit) ---------------------------------------
    weight_bytes = sum(pdims[k] * pdims[k + 1] for k in range(num_layers)) * c_itemsize
    bias_bytes = num_layers * max_out * 4
    x_tile_bytes = 2 * TB * pdims[0] * c_itemsize          # double-buffered in
    out_tile_bytes = 2 * TB * pdims[-1] * 4                # double-buffered out
    scratch_bytes = TB * max_hid * c_itemsize
    vmem_bytes = int(1.25 * (weight_bytes + bias_bytes + x_tile_bytes
                             + out_tile_bytes + scratch_bytes))
    vmem_bytes = max(vmem_bytes, 4 * 1024 * 1024)
    vmem_bytes = min(vmem_bytes, 100 * 1024 * 1024)        # stay under physical

    # ---- Cost estimate (true, unpadded work) --------------------------------
    true_flops = 2 * B * sum(dims[k] * dims[k + 1] for k in range(num_layers))
    true_bytes = (B * IN * c_itemsize
                  + sum(dims[k] * dims[k + 1] for k in range(num_layers)) * c_itemsize
                  + sum(d for d in dims[1:]) * 4
                  + B * dims[-1] * 4)
    cost = pl.CostEstimate(flops=true_flops, transcendentals=0,
                           bytes_accessed=int(true_bytes))

    kernel = functools.partial(
        _ffnn_fused_kernel,
        pdims=tuple(pdims),
        compute_dtype=compute_dtype,
    )

    in_specs = [
        # x: tiled over batch (double-buffered by default).
        pl.BlockSpec((TB, pdims[0]), lambda i: (i, 0)),
        # Packed biases: grid-invariant -> single buffer.
        pl.BlockSpec((num_layers, max_out), lambda i: (0, 0),
                     pipeline_mode=pl.Buffered(1)),
    ] + [
        # Full weight blocks: grid-invariant -> single buffer (resident).
        pl.BlockSpec((pdims[k], pdims[k + 1]), lambda i: (0, 0),
                     pipeline_mode=pl.Buffered(1))
        for k in range(num_layers)
    ]

    out = pl.pallas_call(
        kernel,
        out_shape=jax.ShapeDtypeStruct((B_pad, pdims[-1]), jnp.float32),
        grid=(grid_b,),
        in_specs=in_specs,
        out_specs=pl.BlockSpec((TB, pdims[-1]), lambda i: (i, 0)),
        scratch_shapes=[pltpu.VMEM((TB, max_hid), compute_dtype)],
        compiler_params=pltpu.CompilerParams(
            # Batch axis is independent -> shard across TCs on v7x (no-op on v5e/v6e).
            dimension_semantics=("parallel",),
            vmem_limit_bytes=vmem_bytes,
        ),
        cost_estimate=cost,
    )(x_p, b_packed, *w_padded)

    return out[:B, :dims[-1]]


# jit so pad/pack/slice plumbing fuses around the single pallas_call launch.
ffnn_forward = jax.jit(_ffnn_forward_fused,
                       static_argnames=("compute_dtype", "tb"))


def init_ffnn_params(key, input_size, hidden_sizes):
    """Mirrors nn.Linear default init U(-1/sqrt(fan_in), 1/sqrt(fan_in)).
    Weights stored as (in, out) so the kernel does a row-major matmul."""
    h_sizes = [input_size] + list(hidden_sizes)
    params = []
    for k in range(len(h_sizes) - 1):
        fan_in, fan_out = h_sizes[k], h_sizes[k + 1]
        key, kw, kb = jax.random.split(key, 3)
        bound = 1.0 / (fan_in ** 0.5)
        w = jax.random.uniform(kw, (fan_in, fan_out), jnp.float32,
                               minval=-bound, maxval=bound)
        b = jax.random.uniform(kb, (fan_out,), jnp.float32,
                               minval=-bound, maxval=bound)
        params.append((w, b))
    return params


def ffnn_reference(params, x):
    """Pure-JAX reference matching FFNN.forward (eval mode)."""
    for (w, b) in params[:-1]:
        x = jnp.maximum(x @ w + b, 0.0)
    w, b = params[-1]
    return x @ w + b


if __name__ == "__main__":
    key = jax.random.PRNGKey(0)

    batch = 8
    input_size = 32
    hidden_sizes = [64, 48, 16]   # last entry = number of outputs

    key, kx = jax.random.split(key)
    x = jax.random.normal(kx, (batch, input_size), jnp.float32)
    params = init_ffnn_params(key, input_size, hidden_sizes)

    ref = ffnn_reference(params, x)

    # f32 MXU path: tight tolerance vs. reference.
    out_f32 = jax.block_until_ready(
        ffnn_forward(params, x, compute_dtype=jnp.float32))
    assert out_f32.shape == (batch, hidden_sizes[-1])
    assert jnp.allclose(out_f32, ref, atol=1e-4, rtol=1e-4)

    # bf16-operand MXU path (default perf path on v5e/v6e/v7x): f32 accumulate,
    # f32 bias+ReLU, loose tolerance.
    out_bf16 = jax.block_until_ready(ffnn_forward(params, x))
    assert out_bf16.shape == (batch, hidden_sizes[-1])
    assert jnp.allclose(out_bf16, ref, atol=5e-2, rtol=5e-2)

    # Larger-batch sanity check (exercises multi-tile grid + pad trimming).
    key, kx2 = jax.random.split(key)
    x2 = jax.random.normal(kx2, (300, input_size), jnp.float32)
    out2 = jax.block_until_ready(
        ffnn_forward(params, x2, compute_dtype=jnp.float32))
    assert out2.shape == (300, hidden_sizes[-1])
    assert jnp.allclose(out2, ffnn_reference(params, x2), atol=1e-4, rtol=1e-4)

    print("KERNEL_OK")
</pallas_src>

<mosaic_0001>
module attributes {stable_mosaic.version = 11 : i64} {
  func.func @_ffnn_fused_kernel(%arg0: i32, %arg1: memref<8x128xf32, #tpu.memory_space<vmem>>, %arg2: memref<3x128xf32, #tpu.memory_space<vmem>>, %arg3: memref<128x128xf32, #tpu.memory_space<vmem>>, %arg4: memref<128x128xf32, #tpu.memory_space<vmem>>, %arg5: memref<128x128xf32, #tpu.memory_space<vmem>>, %arg6: memref<8x128xf32, #tpu.memory_space<vmem>>, %arg7: memref<8x128xf32, #tpu.memory_space<vmem>>) attributes {dimension_semantics = [#tpu.dimension_semantics<parallel>], iteration_bounds = array<i64: 1>, scalar_prefetch = 0 : i64, scratch_operands = 1 : i64, tpu.core_type = #tpu.core_type<tc>, window_params = [{transform_indices = @transform_0, window_bounds = array<i64: 8, 128>}, {pipeline_mode = #tpu.pipeline_mode<synchronous>, transform_indices = @transform_1, window_bounds = array<i64: 3, 128>}, {pipeline_mode = #tpu.pipeline_mode<synchronous>, transform_indices = @transform_2, window_bounds = array<i64: 128, 128>}, {pipeline_mode = #tpu.pipeline_mode<synchronous>, transform_indices = @transform_3, window_bounds = array<i64: 128, 128>}, {pipeline_mode = #tpu.pipeline_mode<synchronous>, transform_indices = @transform_4, window_bounds = array<i64: 128, 128>}, {transform_indices = @transform_5, window_bounds = array<i64: 8, 128>}]} {
    %c0 = arith.constant 0 : index
    %c0_0 = arith.constant 0 : index
    %0 = vector.load %arg1[%c0, %c0_0] : memref<8x128xf32, #tpu.memory_space<vmem>>, vector<8x128xf32>
    %c0_1 = arith.constant 0 : index
    %c0_2 = arith.constant 0 : index
    %1 = vector.load %arg3[%c0_1, %c0_2] : memref<128x128xf32, #tpu.memory_space<vmem>>, vector<128x128xf32>
    %cst = arith.constant dense<0.000000e+00> : vector<8x128xf32>
    %2 = tpu.matmul %0, %1, %cst {dimension_numbers = #tpu.dot_dimension_numbers<[1], [0], [0], [1], [0, 0, 1, 1], [], []>} : vector<8x128xf32>, vector<128x128xf32>, vector<8x128xf32> -> vector<8x128xf32>
    %c0_3 = arith.constant 0 : index
    %c0_4 = arith.constant 0 : index
    %3 = vector.load %arg2[%c0_3, %c0_4] : memref<3x128xf32, #tpu.memory_space<vmem>>, vector<1x128xf32>
    %4 = vector.broadcast %3 : vector<1x128xf32> to vector<8x128xf32>
    %5 = arith.addf %2, %4 : vector<8x128xf32>
    %cst_5 = arith.constant 0.000000e+00 : f32
    %6 = vector.broadcast %cst_5 : f32 to vector<8x128xf32>
    %7 = arith.maximumf %5, %6 : vector<8x128xf32>
    %c0_6 = arith.constant 0 : index
    %c0_7 = arith.constant 0 : index
    %8 = vector.load %arg7[%c0_6, %c0_7] : memref<8x128xf32, #tpu.memory_space<vmem>>, vector<8x128xf32>
    tpu.vector_store %arg7[%c0_6, %c0_7], %7 {strides = array<i32>} : memref<8x128xf32, #tpu.memory_space<vmem>>, vector<8x128xf32>,
    %c0_8 = arith.constant 0 : index
    %c0_9 = arith.constant 0 : index
    %9 = vector.load %arg7[%c0_8, %c0_9] : memref<8x128xf32, #tpu.memory_space<vmem>>, vector<8x128xf32>
    %c0_10 = arith.constant 0 : index
    %c0_11 = arith.constant 0 : index
    %10 = vector.load %arg4[%c0_10, %c0_11] : memref<128x128xf32, #tpu.memory_space<vmem>>, vector<128x128xf32>
    %cst_12 = arith.constant dense<0.000000e+00> : vector<8x128xf32>
    %11 = tpu.matmul %9, %10, %cst_12 {dimension_numbers = #tpu.dot_dimension_numbers<[1], [0], [0], [1], [0, 0, 1, 1], [], []>} : vector<8x128xf32>, vector<128x128xf32>, vector<8x128xf32> -> vector<8x128xf32>
    %c1 = arith.constant 1 : index
    %c0_13 = arith.constant 0 : index
    %12 = vector.load %arg2[%c1, %c0_13] : memref<3x128xf32, #tpu.memory_space<vmem>>, vector<1x128xf32>
    %13 = vector.broadcast %12 : vector<1x128xf32> to vector<8x128xf32>
    %14 = arith.addf %11, %13 : vector<8x128xf32>
    %cst_14 = arith.constant 0.000000e+00 : f32
    %15 = vector.broadcast %cst_14 : f32 to vector<8x128xf32>
    %16 = arith.maximumf %14, %15 : vector<8x128xf32>
    %c0_15 = arith.constant 0 : index
    %c0_16 = arith.constant 0 : index
    %17 = vector.load %arg7[%c0_15, %c0_16] : memref<8x128xf32, #tpu.memory_space<vmem>>, vector<8x128xf32>
    tpu.vector_store %arg7[%c0_15, %c0_16], %16 {strides = array<i32>} : memref<8x128xf32, #tpu.memory_space<vmem>>, vector<8x128xf32>,
    %c0_17 = arith.constant 0 : index
    %c0_18 = arith.constant 0 : index
    %18 = vector.load %arg7[%c0_17, %c0_18] : memref<8x128xf32, #tpu.memory_space<vmem>>, vector<8x128xf32>
    %c0_19 = arith.constant 0 : index
    %c0_20 = arith.constant 0 : index
    %19 = vector.load %arg5[%c0_19, %c0_20] : memref<128x128xf32, #tpu.memory_space<vmem>>, vector<128x128xf32>
    %cst_21 = arith.constant dense<0.000000e+00> : vector<8x128xf32>
    %20 = tpu.matmul %18, %19, %cst_21 {dimension_numbers = #tpu.dot_dimension_numbers<[1], [0], [0], [1], [0, 0, 1, 1], [], []>} : vector<8x128xf32>, vector<128x128xf32>, vector<8x128xf32> -> vector<8x128xf32>
    %c2 = arith.constant 2 : index
    %c0_22 = arith.constant 0 : index
    %21 = vector.load %arg2[%c2, %c0_22] : memref<3x128xf32, #tpu.memory_space<vmem>>, vector<1x128xf32>
    %22 = vector.broadcast %21 : vector<1x128xf32> to vector<8x128xf32>
    %23 = arith.addf %20, %22 : vector<8x128xf32>
    %c0_23 = arith.constant 0 : index
    %c0_24 = arith.constant 0 : index
    %24 = vector.load %arg6[%c0_23, %c0_24] : memref<8x128xf32, #tpu.memory_space<vmem>>, vector<8x128xf32>
    tpu.vector_store %arg6[%c0_23, %c0_24], %23 {strides = array<i32>} : memref<8x128xf32, #tpu.memory_space<vmem>>, vector<8x128xf32>,
    return
  }
  func.func @transform_0(%arg0: i32) -> (i32, i32) {
    %c0_i32 = arith.constant 0 : i32
    %c0_i32_0 = arith.constant 0 : i32
    return %arg0, %c0_i32 : i32, i32
  }
  func.func @transform_1(%arg0: i32) -> (i32, i32) {
    %c0_i32 = arith.constant 0 : i32
    %c0_i32_0 = arith.constant 0 : i32
    %c0_i32_1 = arith.constant 0 : i32
    return %c0_i32, %c0_i32_0 : i32, i32
  }
  func.func @transform_2(%arg0: i32) -> (i32, i32) {
    %c0_i32 = arith.constant 0 : i32
    %c0_i32_0 = arith.constant 0 : i32
    %c0_i32_1 = arith.constant 0 : i32
    return %c0_i32, %c0_i32_0 : i32, i32
  }
  func.func @transform_3(%arg0: i32) -> (i32, i32) {
    %c0_i32 = arith.constant 0 : i32
    %c0_i32_0 = arith.constant 0 : i32
    %c0_i32_1 = arith.constant 0 : i32
    return %c0_i32, %c0_i32_0 : i32, i32
  }
  func.func @transform_4(%arg0: i32) -> (i32, i32) {
    %c0_i32 = arith.constant 0 : i32
    %c0_i32_0 = arith.constant 0 : i32
    %c0_i32_1 = arith.constant 0 : i32
    return %c0_i32, %c0_i32_0 : i32, i32
  }
  func.func @transform_5(%arg0: i32) -> (i32, i32) {
    %c0_i32 = arith.constant 0 : i32
    %c0_i32_0 = arith.constant 0 : i32
    return %arg0, %c0_i32 : i32, i32
  }
}

</mosaic_0001>

<bundles_post_ra>
// kernel: _ffnn_forward_fused.1
= control target key start
LH: loop header
LB: loop body
LE: loop exit
PB: predicated region body
PF: predicated region fallthrough
CT: control target
= control target key end

     0   :  { %v500_v1 = vmov 0.0   ;;  %vm501_vm0 = vmmov 0   ;;  %s746_s0 = inlined_call_operand.vmem [shape: f32[8,128], index: 0, kind: input, shape index: {}]   ;;  %s747_s1 = inlined_call_operand.vmem [shape: f32[3,128], index: 1, kind: input, shape index: {}]   ;;  %s748_s2 = inlined_call_operand.vmem [shape: f32[128,128], index: 2, kind: input, shape index: {}]   ;;  %s749_s3 = inlined_call_operand.vmem [shape: f32[128,128], index: 3, kind: input, shape index: {}]   ;;  %s750_s4 = inlined_call_operand.vmem [shape: f32[128,128], index: 4, kind: input, shape index: {}]   ;;  %s751_s5 = inlined_call_operand.hbm [shape: f32[8,128], index: 5, kind: output, shape index: {}]  }
   0x1   :  { %v37_v0 = vld [vmem:[%s748_s2 + $0x78] sm:$0xff]  ;;  %370 = vmatprep.subr.mxu0 %v500_v1  ;;  %v36_v2 = vld [vmem:[%s748_s2 + $0x70] sm:$0xff]  ;;  %402 = vmatprep.mubr.msk.f32.mxu0 %vm501_vm0, %v500_v1  ;;  %v35_v3 = vld [vmem:[%s748_s2 + $0x68] sm:$0xff] }
   0x2   :  { %371 = vmatpush3.msra.mxu0 %v37_v0  ;;  %405 = vmatprep.subr.mxu1 %v500_v1  ;;  %v34_v4 = vld [vmem:[%s748_s2 + $0x60] sm:$0xff]  ;;  %v131_v5 = vld [vmem:[%s749_s3 + $0x78] sm:$0xff]  ;;  %v130_v6 = vld [vmem:[%s749_s3 + $0x70] sm:$0xff] }
   0x3   :  { %372 = vmatprep.subr.mxu0 %v500_v1  ;;  %437 = vmatprep.mubr.msk.f32.mxu1 %vm501_vm0, %v500_v1  ;;  %v33_v7 = vld [vmem:[%s748_s2 + $0x58] sm:$0xff]  ;;  %v129_v8 = vld [vmem:[%s749_s3 + $0x68] sm:$0xff]  ;;  %v32_v9 = vld [vmem:[%s748_s2 + $0x50] sm:$0xff] }
   0x4   :  { %373 = vmatpush3.msra.mxu0 %v36_v2  ;;  %406 = vmatpush3.msra.mxu1 %v131_v5  ;;  %v128_v10 = vld [vmem:[%s749_s3 + $0x60] sm:$0xff] }
   0x5   :  { %374 = vmatprep.subr.mxu0 %v500_v1  ;;  %407 = vmatprep.subr.mxu1 %v500_v1 }
   0x6   :  { %375 = vmatpush3.msra.mxu0 %v35_v3  ;;  %408 = vmatpush3.msra.mxu1 %v130_v6 }
   0x7   :  { %376 = vmatprep.subr.mxu0 %v500_v1  ;;  %409 = vmatprep.subr.mxu1 %v500_v1 }
   0x8   :  { %377 = vmatpush3.msra.mxu0 %v34_v4  ;;  %410 = vmatpush3.msra.mxu1 %v129_v8 }
   0x9   :  { %378 = vmatprep.subr.mxu0 %v500_v1 }
   0xa   :  { %379 = vmatpush3.msra.mxu0 %v33_v7 }
   0xb   :  { %10 = vsyncpa [#allocation4], 0  ;;  %380 = vmatprep.subr.mxu0 %v500_v1  ;;  %v31_v11 = vld [vmem:[%s748_s2 + $0x48] sm:$0xff]  ;;  %411 = vmatprep.subr.mxu1 %v500_v1  ;;  %v127_v12 = vld [vmem:[%s749_s3 + $0x58] sm:$0xff]  ;;  %s502_s16 = smov [#allocation3]  }
   0xc   :  { %381 = vmatpush3.msra.mxu0 %v32_v9  ;;  %412 = vmatpush3.msra.mxu1 %v128_v10  ;;  %v30_v13 = vld [vmem:[%s748_s2 + $0x40] sm:$0xff]  ;;  %v126_v14 = vld [vmem:[%s749_s3 + $0x50] sm:$0xff]  ;;  %v29_v15 = vld [vmem:[%s748_s2 + $0x38] sm:$0xff]  ;;  %s308_s17 = sshll.u32 %s502_s16, 4  ;;  %s309_s17 = int_to_ptr.vmem [resolvable:$true] %s308_s17 }
   0xd   :  { %382 = vmatprep.subr.mxu0 %v500_v1  ;;  %413 = vmatprep.subr.mxu1 %v500_v1  ;;  %v125_v16 = vld [vmem:[%s749_s3 + $0x48] sm:$0xff]  ;;  %v28_v17 = vld [vmem:[%s748_s2 + $0x30] sm:$0xff]  ;;  %v124_v18 = vld [vmem:[%s749_s3 + $0x40] sm:$0xff]  ;;  %p483_p1 = scmp.lt.s32.totalorder %s309_s17, %s309_s17 }
   0xe   :  { %383 = vmatpush3.msra.mxu0 %v31_v11  ;;  %414 = vmatpush3.msra.mxu1 %v127_v12  ;;  %v27_v19 = vld [vmem:[%s748_s2 + $0x28] sm:$0xff]  ;;  %v123_v20 = vld [vmem:[%s749_s3 + $0x38] sm:$0xff]  ;;  %v26_v21 = vld [vmem:[%s748_s2 + $0x20] sm:$0xff] }
   0xf   :  { %384 = vmatprep.subr.mxu0 %v500_v1  ;;  %415 = vmatprep.subr.mxu1 %v500_v1  ;;  %v122_v22 = vld [vmem:[%s749_s3 + $0x30] sm:$0xff]  ;;  %v25_v23 = vld [vmem:[%s748_s2 + $0x18] sm:$0xff]  ;;  %v121_v24 = vld [vmem:[%s749_s3 + $0x28] sm:$0xff] }
  0x10   :  { %385 = vmatpush3.msra.mxu0 %v30_v13  ;;  %416 = vmatpush3.msra.mxu1 %v126_v14  ;;  %v24_v25 = vld [vmem:[%s748_s2 + $0x10] sm:$0xff]  ;;  %v120_v26 = vld [vmem:[%s749_s3 + $0x20] sm:$0xff]  ;;  %v23_v27 = vld [vmem:[%s748_s2 + $0x8] sm:$0xff] }
  0x11   :  { %386 = vmatprep.subr.mxu0 %v500_v1  ;;  %417 = vmatprep.subr.mxu1 %v500_v1  ;;  %v119_v28 = vld [vmem:[%s749_s3 + $0x18] sm:$0xff]  ;;  %v22_v29 = vld [vmem:[%s748_s2] sm:$0xff]  ;;  %v118_v31 = vld [vmem:[%s749_s3 + $0x10] sm:$0xff] }
  0x12   :  { %387 = vmatpush3.msra.mxu0 %v29_v15  ;;  %418 = vmatpush3.msra.mxu1 %v125_v16  ;;  %v21_v30 = vld [vmem:[%s746_s0] sm:$0xff]  ;;  %v117_v32 = vld [vmem:[%s749_s3 + $0x8] sm:$0xff]  ;;  %v225_v34 = vld [vmem:[%s750_s4 + $0x78] sm:$0xff] }
  0x13   :  { %388 = vmatprep.subr.mxu0 %v500_v1  ;;  %419 = vmatprep.subr.mxu1 %v500_v1  ;;  %v116_v33 = vld [vmem:[%s749_s3] sm:$0xff]  ;;  %v224_v35 = vld [vmem:[%s750_s4 + $0x70] sm:$0xff]  ;;  %v223_v36 = vld [vmem:[%s750_s4 + $0x68] sm:$0xff] }
  0x14   :  { %389 = vmatpush3.msra.mxu0 %v28_v17  ;;  %420 = vmatpush3.msra.mxu1 %v124_v18  ;;  %v222_v37 = vld [vmem:[%s750_s4 + $0x60] sm:$0xff]  ;;  %v221_v38 = vld [vmem:[%s750_s4 + $0x58] sm:$0xff]  ;;  %v220_v39 = vld [vmem:[%s750_s4 + $0x50] sm:$0xff] }
  0x15   :  { %390 = vmatprep.subr.mxu0 %v500_v1  ;;  %421 = vmatprep.subr.mxu1 %v500_v1  ;;  %v219_v40 = vld [vmem:[%s750_s4 + $0x48] sm:$0xff]  ;;  %v218_v41 = vld [vmem:[%s750_s4 + $0x40] sm:$0xff]  ;;  %v217_v42 = vld [vmem:[%s750_s4 + $0x38] sm:$0xff] }
  0x16   :  { %391 = vmatpush3.msra.mxu0 %v27_v19  ;;  %422 = vmatpush3.msra.mxu1 %v123_v20  ;;  %v216_v43 = vld [vmem:[%s750_s4 + $0x30] sm:$0xff]  ;;  %v215_v44 = vld [vmem:[%s750_s4 + $0x28] sm:$0xff]  ;;  %v214_v45 = vld [vmem:[%s750_s4 + $0x20] sm:$0xff] }
  0x17   :  { %392 = vmatprep.subr.mxu0 %v500_v1  ;;  %423 = vmatprep.subr.mxu1 %v500_v1  ;;  %v213_v46 = vld [vmem:[%s750_s4 + $0x18] sm:$0xff]  ;;  %v316_v47 = vld [vmem:[%s747_s1] ss:$0 sm:$0xff]  ;;  %v212_v52 = vld [vmem:[%s750_s4 + $0x10] sm:$0xff] }
  0x18   :  { %393 = vmatpush3.msra.mxu0 %v26_v21  ;;  %424 = vmatpush3.msra.mxu1 %v122_v22  ;;  %v211_v53 = vld [vmem:[%s750_s4 + $0x8] sm:$0xff]  ;;  %v210_v54 = vld [vmem:[%s750_s4] sm:$0xff]  ;;  %s478_s4 = scalar_lea.vmem %s309_s17, 128 }
  0x19   :  { %394 = vmatprep.subr.mxu0 %v500_v1  ;;  %425 = vmatprep.subr.mxu1 %v500_v1  ;;  %v317_v55 = vld [vmem:[%s747_s1 + $0x1] ss:$0 sm:$0xff]  ;;  %v318_v60 = vld [vmem:[%s747_s1 + $0x2] ss:$0 sm:$0xff]  ;;  %p479_p0 = scmp.ne.s32.totalorder %s309_s17, %s478_s4  ;;  %p484_p2 = scmp.lt.s32.totalorder %s478_s4, %s478_s4 }
  0x1a   :  { %395 = vmatpush3.msra.mxu0 %v25_v23  ;;  %426 = vmatpush3.msra.mxu1 %v121_v24 }
  0x1b   :  { %396 = vmatprep.subr.mxu0 %v500_v1  ;;  %427 = vmatprep.subr.mxu1 %v500_v1  ;;  %p485_p3 = por %p484_p2, %p483_p1 }
  0x1c   :  { %397 = vmatpush3.msra.mxu0 %v24_v25  ;;  %428 = vmatpush3.msra.mxu1 %v120_v26 }
  0x1d   :  { %398 = vmatprep.subr.mxu0 %v500_v1  ;;  %429 = vmatprep.subr.mxu1 %v500_v1  ;;  %p486_p4 = pnand %p485_p3, %p479_p0 }
  0x1e   :  { %399 = vmatpush3.msra.mxu0 %v23_v27  ;;  %430 = vmatpush3.msra.mxu1 %v119_v28 }
  0x1f   :  { %400 = vmatprep.subr.mxu0 %v500_v1  ;;  %431 = vmatprep.subr.mxu1 %v500_v1 }
  0x20   :  { %401 = vmatpush3.msra.mxu0 %v22_v29  ;;  %432 = vmatpush3.msra.mxu1 %v118_v31 }
  0x21   :  { %403 = vmatmul.mubr.f32.vlgmr.msra.gmra.mxu0 %v21_v30  ;;  %440 = vmatprep.subr.mxu0 %v500_v1 }
  0x22   :  { %472 = vmatprep.mubr.msk.f32.mxu0 %vm501_vm0, %v500_v1  ;;  %433 = vmatprep.subr.mxu1 %v500_v1 }
  0x23   :  { %434 = vmatpush3.msra.mxu1 %v117_v32  ;;  %441 = vmatpush3.msra.mxu0 %v225_v34 }
  0x24   :  { %435 = vmatprep.subr.mxu1 %v500_v1  ;;  %442 = vmatprep.subr.mxu0 %v500_v1 }
  0x25   :  { %436 = vmatpush3.msra.mxu1 %v116_v33  ;;  %443 = vmatpush3.msra.mxu0 %v224_v35 }
  0x26   :  { %444 = vmatprep.subr.mxu0 %v500_v1 }
  0x27   :  { %445 = vmatpush3.msra.mxu0 %v223_v36 }
  0x28   :  { %446 = vmatprep.subr.mxu0 %v500_v1 }
  0x29   :  { %447 = vmatpush3.msra.mxu0 %v222_v37 }
  0x2a   :  { %448 = vmatprep.subr.mxu0 %v500_v1 }
  0x2b   :  { %449 = vmatpush3.msra.mxu0 %v221_v38 }
  0x2c   :  { %450 = vmatprep.subr.mxu0 %v500_v1 }
  0x2d   :  { %451 = vmatpush3.msra.mxu0 %v220_v39 }
  0x2e   :  { %452 = vmatprep.subr.mxu0 %v500_v1 }
  0x2f   :  { %453 = vmatpush3.msra.mxu0 %v219_v40 }
  0x30   :  { %454 = vmatprep.subr.mxu0 %v500_v1 }
  0x31   :  { %455 = vmatpush3.msra.mxu0 %v218_v41 }
  0x32   :  { %456 = vmatprep.subr.mxu0 %v500_v1 }
  0x33   :  { %457 = vmatpush3.msra.mxu0 %v217_v42 }
  0x34   :  { %458 = vmatprep.subr.mxu0 %v500_v1 }
  0x35   :  { %459 = vmatpush3.msra.mxu0 %v216_v43 }
  0x36   :  { %460 = vmatprep.subr.mxu0 %v500_v1 }
  0x37   :  { %461 = vmatpush3.msra.mxu0 %v215_v44 }
  0x38   :  { %462 = vmatprep.subr.mxu0 %v500_v1 }
  0x39   :  { %463 = vmatpush3.msra.mxu0 %v214_v45 }
  0x3a   :  { %464 = vmatprep.subr.mxu0 %v500_v1 }
  0x3b   :  { %465 = vmatpush3.msra.mxu0 %v213_v46 }
  0x3c   :  { %466 = vmatprep.subr.mxu0 %v500_v1 }
  0x3d   :  { %467 = vmatpush3.msra.mxu0 %v212_v52 }
  0x3e   :  { %468 = vmatprep.subr.mxu0 %v500_v1 }
  0x3f   :  { %469 = vmatpush3.msra.mxu0 %v211_v53 }
  0x40   :  { %470 = vmatprep.subr.mxu0 %v500_v1 }
  0x41   :  { %471 = vmatpush3.msra.mxu0 %v210_v54 }
  0xe1   :  { %v109_v48 = vpop.f32.mrf.mxu0 }
  0xe2   :  { %v110_v49 = vadd.f32 %v316_v47, %v109_v48 }
  0xe3   :  { %v404_v50 = vpop.f32.mrf.mxu0 }
  0xe4   :  { %v113_v51 = vmax.f32 %v110_v49, 0.0 }
  0xe6   :  { %438 = vmatmul.mubr.f32.vlgmr.msra.gmra.mxu1 %v113_v51 }
 0x1a6   :  { %v203_v56 = vpop.f32.mrf.mxu1 }
 0x1a7   :  { %v204_v57 = vadd.f32 %v317_v55, %v203_v56 }
 0x1a8   :  { %v439_v58 = vpop.f32.mrf.mxu1 }
 0x1a9   :  { %v207_v59 = vmax.f32 %v204_v57, 0.0 }
 0x1ab   :  { %473 = vmatmul.mubr.f32.vlgmr.msra.gmra.mxu0 %v207_v59 }
 0x26b   :  { %v297_v61 = vpop.f32.mrf.mxu0 }
 0x26c   :  { %v298_v62 = vadd.f32 %v318_v60, %v297_v61 }
 0x26d   :  { %v474_v63 = vpop.f32.mrf.mxu0 }
 0x26e   :  { %301 = vst [vmem:[#allocation3] sm:$0xff] %v298_v62 }
 0x26f   :  { %489 = shalt.err (!%p486_p4)
}
 0x270   :  { %311 = dma.vmem_to_hbm [thread:$0]  %s309_s17, 128, %s751_s5, [#allocation4]  }
 0x271   :  { %498 = dma.done.wait [#allocation4], 128  }
 0x272   :  { %499 = vsyncadd [#allocation4], 4294967168 }
 0x273   :  { %315 = vsyncpa [#allocation4], 1 }

</bundles_post_ra>
